<compile_context>
chip_gen: v7x
topology: tpu7x:2x2x1
jax: 0.10.0
libtpu: 0.0.40
codegen_flags: <defaults>
</compile_context>

<pallas_src>
import functools

import jax
import jax.numpy as jnp
from jax.experimental import pallas as pl
from jax.experimental.pallas import tpu as pltpu

HIDDEN = 128      # fixed by the module: nn.Linear(input_dim, 128)
BN_EPS = 1e-5     # PyTorch BatchNorm1d default eps


def _round_up(n, m):
    return (n + m - 1) // m * m


def _pad_cast(a, shape, dtype):
    """Cast + zero-pad in one shot; no-op when already aligned."""
    if a.shape == tuple(shape) and a.dtype == dtype:
        return a
    a = a.astype(dtype)
    pads = tuple((0, t - s) for s, t in zip(a.shape, shape))
    if any(p[1] for p in pads):
        a = jnp.pad(a, pads)
    return a


def _vmem_capacity_bytes():
    try:
        cap = getattr(pltpu.get_tpu_info(), "vmem_capacity_bytes", None)
        if cap:
            return int(cap)
    except Exception:
        pass
    return 64 * 1024 * 1024   # conservative fallback (v7x per-TC size)


def _projection_head_kernel(x_ref, w1_ref, gamma_ref, beta_ref, w2_ref, b2_ref,
                            o_ref, h_acc, *, batch_rows, valid_rows):
    """Grid: (K tiles,). h_acc is a resident [Bp, 128] f32 accumulator."""
    k = pl.program_id(0)

    @pl.when(k == 0)
    def _():
        h_acc[...] = jnp.zeros_like(h_acc)

    # Linear 1 partial product for this K tile: bf16 operands, f32 accumulate.
    # (b1 is omitted: it cancels exactly under train-mode BatchNorm.)
    h_acc[...] += jnp.dot(x_ref[...], w1_ref[...],
                          preferred_element_type=jnp.float32)

    @pl.when(k == pl.num_programs(0) - 1)
    def _():
        h = h_acc[...]                                   # [Bp, 128] f32
        inv_b = 1.0 / batch_rows                         # real (unpadded) B

        # Two-pass BN stats over the VMEM-resident accumulator (epilogue is far
        # from the bottleneck; avoids E[h^2]-E[h]^2 cancellation).
        mean = jnp.sum(h, axis=0, keepdims=True) * inv_b   # padded rows are 0
        centered = h - mean
        if valid_rows < h.shape[0]:
            row_ids = jax.lax.broadcasted_iota(jnp.int32, h.shape, 0)
            centered = jnp.where(row_ids < valid_rows, centered, 0.0)
        var = jnp.sum(centered * centered, axis=0, keepdims=True) * inv_b

        # Fold BN affine into a single per-feature scale/shift, then ReLU.
        scale = gamma_ref[...] * jax.lax.rsqrt(var + BN_EPS)
        shift = beta_ref[...] - mean * scale
        r = jnp.maximum(h * scale + shift, 0.0)

        # Linear 2 (bf16 operands, f32 accumulate), bias in f32.
        out = jnp.dot(r.astype(jnp.bfloat16), w2_ref[...],
                      preferred_element_type=jnp.float32) + b2_ref[...]
        o_ref[...] = out.astype(o_ref.dtype)


def projection_head(x, w1, b1, gamma, beta, w2, b2):
    """x: [B, input_dim]. Weights stored pre-transposed:
       w1 [input_dim, 128], w2 [128, output_dim]. Returns [B, output_dim] f32."""
    # b1 cancels exactly under train-mode BatchNorm (h - mean removes it), so it
    # is intentionally not passed to the kernel (one less DMA + VPU add).
    del b1

    B, K = x.shape
    H = w1.shape[1]
    N = w2.shape[1]
    assert H == HIDDEN
    assert B >= 1

    # Lane / sublane-dense padding. bf16 packs two rows per sublane -> pad the
    # batch to a multiple of 16 so (Bp, tk) bf16 tiles stay unmasked.
    Bp = _round_up(B, 16)
    Kp = _round_up(K, 128)
    Np = _round_up(N, 128)

    # ---- VMEM budget & K-tile selection (v5e/v6e: 128 MiB, v7x: 64 MiB). ----
    vmem_cap = _vmem_capacity_bytes()
    vmem_budget = vmem_cap - 8 * 1024 * 1024      # headroom for compiler scratch

    def _footprint(tk):
        return (2 * Bp * tk * 2            # x tiles (bf16, double-buffered)
                + 2 * tk * HIDDEN * 2      # w1 tiles (bf16, double-buffered)
                + 2 * HIDDEN * 4           # gamma + beta (f32, single-buffered)
                + HIDDEN * Np * 2          # w2 (bf16, single-buffered)
                + Np * 4                   # b2 (f32, single-buffered)
                + 2 * Bp * Np * 4          # resident output block (+writeback)
                + Bp * HIDDEN * 4)         # h accumulator scratch

    tk = 128
    for cand in (2048, 1024, 512, 256):    # biggest tile that divides Kp & fits
        if Kp % cand == 0 and _footprint(cand) <= vmem_budget:
            tk = cand
            break
    nk = Kp // tk
    vmem_limit = int(min(vmem_budget,
                         max(32 * 1024 * 1024, int(1.25 * _footprint(tk)))))

    # ---- Operand padding / dtype (bf16 streaming operands, f32 small ones). --
    xp = _pad_cast(x, (Bp, Kp), jnp.bfloat16)
    w1p = _pad_cast(w1, (Kp, H), jnp.bfloat16)
    w2p = _pad_cast(w2, (H, Np), jnp.bfloat16)
    b2p = _pad_cast(b2.reshape(1, N), (1, Np), jnp.float32)
    g = gamma.reshape(1, H).astype(jnp.float32)
    bt = beta.reshape(1, H).astype(jnp.float32)

    kernel = functools.partial(_projection_head_kernel,
                               batch_rows=float(B), valid_rows=int(B))

    # Advisory cost estimate for the XLA scheduler (bf16 streaming operands).
    flops = int(2 * Bp * Kp * H + 2 * Bp * H * Np)
    bytes_accessed = int(2 * Bp * Kp + 2 * Kp * H + 4 * 2 * H
                         + 2 * H * Np + 4 * Np + 4 * Bp * Np)

    # Grid-invariant operands are single-buffered (constant index_map => never
    # re-fetched; the second buffer is pure VMEM waste, esp. on v7x).
    invariant = pl.Buffered(1)

    out = pl.pallas_call(
        kernel,
        out_shape=jax.ShapeDtypeStruct((Bp, Np), jnp.float32),
        grid_spec=pltpu.PrefetchScalarGridSpec(
            num_scalar_prefetch=0,
            grid=(nk,),
            in_specs=[
                pl.BlockSpec((Bp, tk), lambda k: (0, k)),   # x   K-tiled bf16
                pl.BlockSpec((tk, H), lambda k: (k, 0)),    # w1  K-tiled bf16
                pl.BlockSpec((1, H), lambda k: (0, 0),      # gamma
                             pipeline_mode=invariant),
                pl.BlockSpec((1, H), lambda k: (0, 0),      # beta
                             pipeline_mode=invariant),
                pl.BlockSpec((H, Np), lambda k: (0, 0),     # w2 bf16
                             pipeline_mode=invariant),
                pl.BlockSpec((1, Np), lambda k: (0, 0),     # b2
                             pipeline_mode=invariant),
            ],
            out_specs=pl.BlockSpec((Bp, Np), lambda k: (0, 0)),
            scratch_shapes=[pltpu.VMEM((Bp, H), jnp.float32)],
        ),
        compiler_params=pltpu.CompilerParams(
            dimension_semantics=("arbitrary",),    # K is a reduction axis
            vmem_limit_bytes=vmem_limit,
        ),
        cost_estimate=pl.CostEstimate(
            flops=flops, transcendentals=0, bytes_accessed=bytes_accessed),
    )(xp, w1p, g, bt, w2p, b2p)

    return out[:B, :N]


def init_params(key, input_dim, output_dim):
    """Deterministic synthetic parameter init (shapes match the PyTorch module)."""
    k1, k2, k3, k4 = jax.random.split(key, 4)
    bound1 = 1.0 / (input_dim ** 0.5)
    w1 = jax.random.uniform(k1, (input_dim, HIDDEN), jnp.float32, -bound1, bound1)
    b1 = jax.random.uniform(k2, (1, HIDDEN), jnp.float32, -bound1, bound1)
    gamma = jnp.ones((1, HIDDEN), jnp.float32)
    beta = jnp.zeros((1, HIDDEN), jnp.float32)
    bound2 = 1.0 / (HIDDEN ** 0.5)
    w2 = jax.random.uniform(k3, (HIDDEN, output_dim), jnp.float32, -bound2, bound2)
    b2 = jax.random.uniform(k4, (1, output_dim), jnp.float32, -bound2, bound2)
    return w1, b1, gamma, beta, w2, b2


def reference_f32(x, w1, b1, gamma, beta, w2, b2):
    """Pure-f32, PyTorch-style (two-pass BN, with b1) forward."""
    h = x @ w1 + b1
    mean = jnp.mean(h, axis=0, keepdims=True)
    var = jnp.mean((h - mean) ** 2, axis=0, keepdims=True)
    hn = (h - mean) / jnp.sqrt(var + BN_EPS) * gamma + beta
    r = jnp.maximum(hn, 0.0)
    return r @ w2 + b2


def reference_matched(x, w1, gamma, beta, w2, b2, batch_rows):
    """Numerics-matched reference (bf16 matmul operands, two-pass BN, no b1)."""
    h = jnp.dot(x.astype(jnp.bfloat16), w1.astype(jnp.bfloat16),
                preferred_element_type=jnp.float32)
    mean = jnp.sum(h, axis=0, keepdims=True) / batch_rows
    var = jnp.sum((h - mean) ** 2, axis=0, keepdims=True) / batch_rows
    scale = gamma * jax.lax.rsqrt(var + BN_EPS)
    shift = beta - mean * scale
    r = jnp.maximum(h * scale + shift, 0.0)
    return jnp.dot(r.astype(jnp.bfloat16), w2.astype(jnp.bfloat16),
                   preferred_element_type=jnp.float32) + b2


if __name__ == "__main__":
    B, input_dim, output_dim = 8, 32, 16
    key = jax.random.PRNGKey(0)
    kx, kp = jax.random.split(key)
    x = jax.random.normal(kx, (B, input_dim), jnp.float32)
    params = init_params(kp, input_dim, output_dim)

    out = jax.jit(projection_head)(x, *params)
    out = jax.block_until_ready(out)
    assert out.shape == (B, output_dim)

    w1, b1, gamma, beta, w2, b2 = params
    # Tight check vs. a reference with matching numerics (bf16 MXU feeds).
    ref_m = reference_matched(x, w1, gamma, beta, w2, b2, float(B))
    assert jnp.allclose(out, ref_m, atol=2e-3, rtol=2e-3), \
        "mismatch vs matched-numerics reference"
    # Looser check vs. the full-precision PyTorch-style forward (bf16 error).
    ref_f = reference_f32(x, *params)
    assert jnp.allclose(out, ref_f, atol=5e-2, rtol=5e-2), \
        "mismatch vs f32 reference"

    print("KERNEL_OK")
</pallas_src>

<mosaic_0001>
module attributes {stable_mosaic.version = 11 : i64} {
  func.func @_projection_head_kernel(%arg0: i32, %arg1: memref<16x128xbf16, #tpu.memory_space<vmem>>, %arg2: memref<128x128xbf16, #tpu.memory_space<vmem>>, %arg3: memref<1x128xf32, #tpu.memory_space<vmem>>, %arg4: memref<1x128xf32, #tpu.memory_space<vmem>>, %arg5: memref<128x128xbf16, #tpu.memory_space<vmem>>, %arg6: memref<1x128xf32, #tpu.memory_space<vmem>>, %arg7: memref<16x128xf32, #tpu.memory_space<vmem>>, %arg8: memref<16x128xf32, #tpu.memory_space<vmem>>) attributes {dimension_semantics = [#tpu.dimension_semantics<arbitrary>], iteration_bounds = array<i64: 1>, scalar_prefetch = 0 : i64, scratch_operands = 1 : i64, tpu.core_type = #tpu.core_type<tc>, window_params = [{transform_indices = @transform_0, window_bounds = array<i64: 16, 128>}, {transform_indices = @transform_1, window_bounds = array<i64: 128, 128>}, {pipeline_mode = #tpu.pipeline_mode<synchronous>, transform_indices = @transform_2, window_bounds = array<i64: 1, 128>}, {pipeline_mode = #tpu.pipeline_mode<synchronous>, transform_indices = @transform_3, window_bounds = array<i64: 1, 128>}, {pipeline_mode = #tpu.pipeline_mode<synchronous>, transform_indices = @transform_4, window_bounds = array<i64: 128, 128>}, {pipeline_mode = #tpu.pipeline_mode<synchronous>, transform_indices = @transform_5, window_bounds = array<i64: 1, 128>}, {pipeline_mode = #tpu.pipeline_mode<synchronous>, transform_indices = @transform_6, window_bounds = array<i64: 16, 128>}]} {
    %c0_i32 = arith.constant 0 : i32
    %0 = arith.cmpi eq, %arg0, %c0_i32 : i32
    %1 = arith.extui %0 : i1 to i32
    %c0_i32_0 = arith.constant 0 : i32
    %2 = arith.cmpi ne, %1, %c0_i32_0 : i32
    scf.if %2 {
      %cst_10 = arith.constant 0.000000e+00 : f32
      %12 = vector.broadcast %cst_10 : f32 to vector<16x128xf32>
      %c0_11 = arith.constant 0 : index
      %c0_12 = arith.constant 0 : index
      %13 = vector.load %arg8[%c0_11, %c0_12] : memref<16x128xf32, #tpu.memory_space<vmem>>, vector<16x128xf32>
      tpu.vector_store %arg8[%c0_11, %c0_12], %12 {strides = array<i32>} : memref<16x128xf32, #tpu.memory_space<vmem>>, vector<16x128xf32>,
    } else {
    }
    %c0 = arith.constant 0 : index
    %c0_1 = arith.constant 0 : index
    %3 = vector.load %arg8[%c0, %c0_1] : memref<16x128xf32, #tpu.memory_space<vmem>>, vector<16x128xf32>
    %c0_2 = arith.constant 0 : index
    %c0_3 = arith.constant 0 : index
    %4 = vector.load %arg1[%c0_2, %c0_3] : memref<16x128xbf16, #tpu.memory_space<vmem>>, vector<16x128xbf16>
    %c0_4 = arith.constant 0 : index
    %c0_5 = arith.constant 0 : index
    %5 = vector.load %arg2[%c0_4, %c0_5] : memref<128x128xbf16, #tpu.memory_space<vmem>>, vector<128x128xbf16>
    %cst = arith.constant dense<0.000000e+00> : vector<16x128xf32>
    %6 = tpu.matmul %4, %5, %cst {dimension_numbers = #tpu.dot_dimension_numbers<[1], [0], [0], [1], [0, 0, 1, 1], [], []>} : vector<16x128xbf16>, vector<128x128xbf16>, vector<16x128xf32> -> vector<16x128xf32>
    %7 = arith.addf %3, %6 : vector<16x128xf32>
    %c0_6 = arith.constant 0 : index
    %c0_7 = arith.constant 0 : index
    %8 = vector.load %arg8[%c0_6, %c0_7] : memref<16x128xf32, #tpu.memory_space<vmem>>, vector<16x128xf32>
    tpu.vector_store %arg8[%c0_6, %c0_7], %7 {strides = array<i32>} : memref<16x128xf32, #tpu.memory_space<vmem>>, vector<16x128xf32>,
    %c0_i32_8 = arith.constant 0 : i32
    %9 = arith.cmpi eq, %arg0, %c0_i32_8 : i32
    %10 = arith.extui %9 : i1 to i32
    %c0_i32_9 = arith.constant 0 : i32
    %11 = arith.cmpi ne, %10, %c0_i32_9 : i32
    scf.if %11 {
      %c0_10 = arith.constant 0 : index
      %c0_11 = arith.constant 0 : index
      %12 = vector.load %arg8[%c0_10, %c0_11] : memref<16x128xf32, #tpu.memory_space<vmem>>, vector<16x128xf32>
      %cst_12 = arith.constant dense<0.000000e+00> : vector<128xf32>
      %13 = vector.multi_reduction <add>, %12, %cst_12 [0] : vector<16x128xf32> to vector<128xf32>
      %14 = vector.shape_cast %13 : vector<128xf32> to vector<1x128xf32>
      %cst_13 = arith.constant 1.250000e-01 : f32
      %15 = vector.broadcast %cst_13 : f32 to vector<1x128xf32>
      %16 = arith.mulf %14, %15 : vector<1x128xf32>
      %17 = vector.broadcast %16 : vector<1x128xf32> to vector<16x128xf32>
      %18 = arith.subf %12, %17 : vector<16x128xf32>
      %19 = tpu.iota {dimensions = array<i32: 0>} : vector<16x128xi32>
      %c8_i32 = arith.constant 8 : i32
      %20 = vector.broadcast %c8_i32 : i32 to vector<16x128xi32>
      %21 = arith.cmpi slt, %19, %20 : vector<16x128xi32>
      %cst_14 = arith.constant 0.000000e+00 : f32
      %22 = vector.broadcast %cst_14 : f32 to vector<16x128xf32>
      %23 = arith.select %21, %18, %22 : vector<16x128xi1>, vector<16x128xf32>
      %24 = arith.mulf %23, %23 : vector<16x128xf32>
      %cst_15 = arith.constant dense<0.000000e+00> : vector<128xf32>
      %25 = vector.multi_reduction <add>, %24, %cst_15 [0] : vector<16x128xf32> to vector<128xf32>
      %26 = vector.shape_cast %25 : vector<128xf32> to vector<1x128xf32>
      %cst_16 = arith.constant 1.250000e-01 : f32
      %27 = vector.broadcast %cst_16 : f32 to vector<1x128xf32>
      %28 = arith.mulf %26, %27 : vector<1x128xf32>
      %c0_17 = arith.constant 0 : index
      %c0_18 = arith.constant 0 : index
      %29 = vector.load %arg3[%c0_17, %c0_18] : memref<1x128xf32, #tpu.memory_space<vmem>>, vector<1x128xf32>
      %cst_19 = arith.constant 9.99999974E-6 : f32
      %30 = vector.broadcast %cst_19 : f32 to vector<1x128xf32>
      %31 = arith.addf %28, %30 : vector<1x128xf32>
      %32 = math.rsqrt %31 : vector<1x128xf32>
      %33 = arith.mulf %29, %32 : vector<1x128xf32>
      %c0_20 = arith.constant 0 : index
      %c0_21 = arith.constant 0 : index
      %34 = vector.load %arg4[%c0_20, %c0_21] : memref<1x128xf32, #tpu.memory_space<vmem>>, vector<1x128xf32>
      %35 = arith.mulf %16, %33 : vector<1x128xf32>
      %36 = arith.subf %34, %35 : vector<1x128xf32>
      %37 = vector.broadcast %33 : vector<1x128xf32> to vector<16x128xf32>
      %38 = arith.mulf %12, %37 : vector<16x128xf32>
      %39 = vector.broadcast %36 : vector<1x128xf32> to vector<16x128xf32>
      %40 = arith.addf %38, %39 : vector<16x128xf32>
      %cst_22 = arith.constant 0.000000e+00 : f32
      %41 = vector.broadcast %cst_22 : f32 to vector<16x128xf32>
      %42 = arith.maximumf %40, %41 : vector<16x128xf32>
      %43 = arith.truncf %42 : vector<16x128xf32> to vector<16x128xbf16>
      %c0_23 = arith.constant 0 : index
      %c0_24 = arith.constant 0 : index
      %44 = vector.load %arg5[%c0_23, %c0_24] : memref<128x128xbf16, #tpu.memory_space<vmem>>, vector<128x128xbf16>
      %cst_25 = arith.constant dense<0.000000e+00> : vector<16x128xf32>
      %45 = tpu.matmul %43, %44, %cst_25 {dimension_numbers = #tpu.dot_dimension_numbers<[1], [0], [0], [1], [0, 0, 1, 1], [], []>} : vector<16x128xbf16>, vector<128x128xbf16>, vector<16x128xf32> -> vector<16x128xf32>
      %c0_26 = arith.constant 0 : index
      %c0_27 = arith.constant 0 : index
      %46 = vector.load %arg6[%c0_26, %c0_27] : memref<1x128xf32, #tpu.memory_space<vmem>>, vector<1x128xf32>
      %47 = vector.broadcast %46 : vector<1x128xf32> to vector<16x128xf32>
      %48 = arith.addf %45, %47 : vector<16x128xf32>
      %c0_28 = arith.constant 0 : index
      %c0_29 = arith.constant 0 : index
      %49 = vector.load %arg7[%c0_28, %c0_29] : memref<16x128xf32, #tpu.memory_space<vmem>>, vector<16x128xf32>
      tpu.vector_store %arg7[%c0_28, %c0_29], %48 {strides = array<i32>} : memref<16x128xf32, #tpu.memory_space<vmem>>, vector<16x128xf32>,
    } else {
    }
    return
  }
  func.func @transform_0(%arg0: i32) -> (i32, i32) {
    %c0_i32 = arith.constant 0 : i32
    %c0_i32_0 = arith.constant 0 : i32
    return %c0_i32, %arg0 : i32, i32
  }
  func.func @transform_1(%arg0: i32) -> (i32, i32) {
    %c0_i32 = arith.constant 0 : i32
    %c0_i32_0 = arith.constant 0 : i32
    return %arg0, %c0_i32 : i32, i32
  }
  func.func @transform_2(%arg0: i32) -> (i32, i32) {
    %c0_i32 = arith.constant 0 : i32
    %c0_i32_0 = arith.constant 0 : i32
    %c0_i32_1 = arith.constant 0 : i32
    return %c0_i32, %c0_i32_0 : i32, i32
  }
  func.func @transform_3(%arg0: i32) -> (i32, i32) {
    %c0_i32 = arith.constant 0 : i32
    %c0_i32_0 = arith.constant 0 : i32
    %c0_i32_1 = arith.constant 0 : i32
    return %c0_i32, %c0_i32_0 : i32, i32
  }
  func.func @transform_4(%arg0: i32) -> (i32, i32) {
    %c0_i32 = arith.constant 0 : i32
    %c0_i32_0 = arith.constant 0 : i32
    %c0_i32_1 = arith.constant 0 : i32
    return %c0_i32, %c0_i32_0 : i32, i32
  }
  func.func @transform_5(%arg0: i32) -> (i32, i32) {
    %c0_i32 = arith.constant 0 : i32
    %c0_i32_0 = arith.constant 0 : i32
    %c0_i32_1 = arith.constant 0 : i32
    return %c0_i32, %c0_i32_0 : i32, i32
  }
  func.func @transform_6(%arg0: i32) -> (i32, i32) {
    %c0_i32 = arith.constant 0 : i32
    %c0_i32_0 = arith.constant 0 : i32
    %c0_i32_1 = arith.constant 0 : i32
    return %c0_i32, %c0_i32_0 : i32, i32
  }
}

</mosaic_0001>

<bundles_post_ra>
// kernel: projection_head.1
= control target key start
LH: loop header
LB: loop body
LE: loop exit
PB: predicated region body
PF: predicated region fallthrough
CT: control target
= control target key end

     0   :  { %v422_v0 = vmov 0.0   ;;  %vm423_vm0 = vmmov 0   ;;  %v189_v40 = vlaneseq  ;;  %s525_s1 = inlined_call_operand.vmem [shape: bf16[128,128], index: 1, kind: input, shape index: {}]   ;;  %s526_s0 = inlined_call_operand.vmem [shape: bf16[16,128], index: 0, kind: input, shape index: {}]   ;;  %s527_s4 = inlined_call_operand.vmem [shape: bf16[128,128], index: 4, kind: input, shape index: {}]   ;;  %s528_s2 = inlined_call_operand.vmem [shape: f32[1,128], index: 2, kind: input, shape index: {}]   ;;  %s529_s3 = inlined_call_operand.vmem [shape: f32[1,128], index: 3, kind: input, shape index: {}]   ;;  %s530_s5 = inlined_call_operand.vmem [shape: f32[1,128], index: 5, kind: input, shape index: {}]   ;;  %s531_s6 = inlined_call_operand.vmem [shape: f32[16,128], index: 6, kind: output, shape index: {}]  }
   0x1   :  { %361 = vmatprep.subr.bf16.mxu0 %v422_v0  ;;  %v403_v1 = vld [vmem:[%s525_s1] sm:$0xff]   ;;  %377 = vmatprep.mubr.msk.bf16.mxu0 %vm423_vm0, %v422_v0  ;;  %v404_v2 = vld [vmem:[%s525_s1 + $0x8] sm:$0xff]   ;;  %v405_v3 = vld [vmem:[%s525_s1 + $0x10] sm:$0xff]  }
   0x2   :  { %381 = vmatprep.subr.bf16.mxu1 %v422_v0  ;;  %397 = vmatprep.mubr.msk.bf16.mxu1 %vm423_vm0, %v422_v0  ;;  %v406_v4 = vld [vmem:[%s525_s1 + $0x18] sm:$0xff]   ;;  %v407_v5 = vld [vmem:[%s525_s1 + $0x20] sm:$0xff]   ;;  %v408_v6 = vld [vmem:[%s525_s1 + $0x28] sm:$0xff]   ;;  %v190_v41 = vshrl.u32 %v189_v40, 7 }
   0x3   :  { %362 = vmatpush3.bf16.msra.mxu0 %v403_v1  ;;  %v409_v7 = vld [vmem:[%s525_s1 + $0x30] sm:$0xff]   ;;  %v410_v8 = vld [vmem:[%s525_s1 + $0x38] sm:$0xff]   ;;  %v411_v9 = vld [vmem:[%s526_s0] sm:$0xff]  }
   0x4   :  { %363 = vmatprep.subr.bf16.mxu0 %v422_v0  ;;  %v412_v10 = vld [vmem:[%s527_s4] sm:$0xff]   ;;  %v413_v11 = vld [vmem:[%s527_s4 + $0x8] sm:$0xff]   ;;  %v414_v12 = vld [vmem:[%s527_s4 + $0x10] sm:$0xff]   ;;  %v191_v43 = vsub.s32 0, %v190_v41 }
   0x5   :  { %382 = vmatpush3.bf16.msra.mxu1 %v412_v10  ;;  %v415_v13 = vld [vmem:[%s527_s4 + $0x18] sm:$0xff]   ;;  %v416_v14 = vld [vmem:[%s527_s4 + $0x20] sm:$0xff]   ;;  %v417_v15 = vld [vmem:[%s527_s4 + $0x28] sm:$0xff]  }
   0x6   :  { %383 = vmatprep.subr.bf16.mxu1 %v422_v0  ;;  %v418_v16 = vld [vmem:[%s527_s4 + $0x30] sm:$0xff]   ;;  %v419_v17 = vld [vmem:[%s527_s4 + $0x38] sm:$0xff]   ;;  %v181_v42 = vld [vmem:[%s528_s2] sm:$0x1] }
   0x7   :  { %364 = vmatpush3.bf16.msra.mxu0 %v404_v2  ;;  %v185_v46 = vld [vmem:[%s529_s3] sm:$0x1] }
   0x8   :  { %365 = vmatprep.subr.bf16.mxu0 %v422_v0  ;;  %v334_v58 = vld [vmem:[%s530_s5] ss:$0 sm:$0xff] }
   0x9   :  { %384 = vmatpush3.bf16.msra.mxu1 %v413_v11 }
   0xa   :  { %385 = vmatprep.subr.bf16.mxu1 %v422_v0 }
   0xb   :  { %366 = vmatpush3.bf16.msra.mxu0 %v405_v3 }
   0xc   :  { %367 = vmatprep.subr.bf16.mxu0 %v422_v0 }
   0xd   :  { %386 = vmatpush3.bf16.msra.mxu1 %v414_v12 }
   0xe   :  { %387 = vmatprep.subr.bf16.mxu1 %v422_v0 }
   0xf   :  { %368 = vmatpush3.bf16.msra.mxu0 %v406_v4 }
  0x10   :  { %369 = vmatprep.subr.bf16.mxu0 %v422_v0 }
  0x11   :  { %388 = vmatpush3.bf16.msra.mxu1 %v415_v13 }
  0x12   :  { %389 = vmatprep.subr.bf16.mxu1 %v422_v0 }
  0x13   :  { %370 = vmatpush3.bf16.msra.mxu0 %v407_v5 }
  0x14   :  { %371 = vmatprep.subr.bf16.mxu0 %v422_v0 }
  0x15   :  { %390 = vmatpush3.bf16.msra.mxu1 %v416_v14 }
  0x16   :  { %391 = vmatprep.subr.bf16.mxu1 %v422_v0 }
  0x17   :  { %372 = vmatpush3.bf16.msra.mxu0 %v408_v6 }
  0x18   :  { %373 = vmatprep.subr.bf16.mxu0 %v422_v0 }
  0x19   :  { %392 = vmatpush3.bf16.msra.mxu1 %v417_v15 }
  0x1a   :  { %393 = vmatprep.subr.bf16.mxu1 %v422_v0 }
  0x1b   :  { %374 = vmatpush3.bf16.msra.mxu0 %v409_v7 }
  0x1c   :  { %375 = vmatprep.subr.bf16.mxu0 %v422_v0 }
  0x1d   :  { %394 = vmatpush3.bf16.msra.mxu1 %v418_v16 }
  0x1e   :  { %395 = vmatprep.subr.bf16.mxu1 %v422_v0 }
  0x1f   :  { %376 = vmatpush3.bf16.msra.mxu0 %v410_v8 }
  0x21   :  { %396 = vmatpush3.bf16.msra.mxu1 %v419_v17 }
  0x22   :  { %378 = vmatmul.mubr.bf16.vlgmr.msra.gmra.mrb[0].mxu0 %v411_v9 }
  0xf5   :  { %v138_v18 = vpop.f32.mrb[0].mxu0 }
  0xf6   :  { %v379_v19 = vpop.f32.mrb[1].mxu0 }
  0xf7   :  { %v141_v20 = vpop.f32.mrb[2].mxu0 }
  0xf8   :  { %v154_v21 = vadd.f32 %v141_v20, %v138_v18  ;;  %v380_v22 = vpop.f32.mrb[3].mxu0 }
  0xfa   :  { %v155_v23 = vrot.slane %v154_v21, 4 }
  0xfc   :  { %v156_v24 = vadd.f32 %v155_v23, %v154_v21 }
  0xfe   :  { %v157_v25 = vrot.slane %v156_v24, 2 }
 0x100   :  { %v158_v26 = vadd.f32 %v157_v25, %v156_v24 }
 0x102   :  { %v159_v27 = vrot.slane %v158_v26, 1 }
 0x104   :  { %v160_v28 = vadd.f32 %v159_v27, %v158_v26 }
 0x106   :  { %v161_v29 = vmul.f32 0.125, %v160_v28 }
 0x108   :  { %v162_v30 = vsub.f32 %v138_v18, %v161_v29 }
 0x10a   :  { %v171_v31 = vmul.f32 %v162_v30, %v162_v30 }
 0x10c   :  { %v174_v32 = vrot.slane %v171_v31, 4 }
 0x10e   :  { %v175_v33 = vadd.f32 %v174_v32, %v171_v31 }
 0x110   :  { %v176_v34 = vrot.slane %v175_v33, 2 }
 0x112   :  { %v177_v35 = vadd.f32 %v176_v34, %v175_v33 }
 0x114   :  { %v178_v36 = vrot.slane %v177_v35, 1 }
 0x116   :  { %v179_v37 = vadd.f32 %v178_v36, %v177_v35 }
 0x118   :  { %v180_v38 = vmul.f32 0.125, %v179_v37 }
 0x11a   :  { %v182_v39 = vadd.f32 1e-05, %v180_v38 }
 0x11c   :  { %420 = vrsqrt.f32 %v182_v39 }
 0x126   :  { %v421_v44 = vpop.eup %420 }
 0x127   :  { %v184_v45 = vmul.f32 %v421_v44, %v181_v42 }
 0x129   :  { %v186_v47 = vmul.f32 %v184_v45, %v161_v29  ;;  %v192_v48 = vrot.slane %v184_v45, %v191_v43 }
 0x12b   :  { %v187_v49 = vsub.f32 %v185_v46, %v186_v47  ;;  %v194_v50 = vmul.f32 %v192_v48, %v138_v18  ;;  %v195_v51 = vmul.f32 %v192_v48, %v141_v20 }
 0x12d   :  { %v200_v52 = vrot.slane %v187_v49, %v191_v43 }
 0x12f   :  { %v203_v53 = vadd.f32 %v200_v52, %v195_v51  ;;  %v202_v54 = vadd.f32 %v200_v52, %v194_v50 }
 0x131   :  { %v205_v55 = vmax.f32 %v203_v53, 0.0  ;;  %v204_v56 = vmax.f32 %v202_v54, 0.0 }
 0x133   :  { %v206_v57 = vpack.c.bf16 %v205_v55, %v204_v56 }
 0x135   :  { %398 = vmatmul.mubr.bf16.vlgmr.msra.gmra.mrb[0].mxu1 %v206_v57 }
 0x208   :  { %v312_v59 = vpop.f32.mrb[0].mxu1 }
 0x209   :  { %v313_v60 = vadd.f32 %v334_v58, %v312_v59  ;;  %v399_v61 = vpop.f32.mrb[1].mxu1 }
 0x20a   :  { %v315_v62 = vpop.f32.mrb[2].mxu1 }
 0x20b   :  { %319 = vst [vmem:[%s531_s6] sm:$0xff] %v313_v60  ;;  %v316_v63 = vadd.f32 %v334_v58, %v315_v62  ;;  %v400_v0 = vpop.f32.mrb[3].mxu1 }
 0x20d   :  { %320 = vst [vmem:[%s531_s6 + $0x8] sm:$0xff] %v316_v63 }

</bundles_post_ra>
